<compile_context>
chip_gen: v7x
topology: tpu7x:2x2x1
jax: 0.10.0
libtpu: 0.0.40
codegen_flags: <defaults>
</compile_context>

<pallas_src>
import functools

import jax
import jax.numpy as jnp
from jax import lax
from jax.experimental import pallas as pl
from jax.experimental.pallas import tpu as pltpu


D_IN, D_H1, D_H2, D_OUT = 512, 512, 128, 64
D_OUTP = 128          # lane-dense padded width of the last layer
BN_EPS = 1e-5


def _mlp_head_kernel(x_ref, w1_ref, b1_ref, w2_ref, b2_ref, w3_ref, b3_ref, o_ref):
    # x_ref : (TM, 512)  bf16      w1_ref: (512, 512) bf16   b1_ref: (1, 512) f32
    # w2_ref: (512, 128) bf16      b2_ref: (1, 128)   f32
    # w3_ref: (128, 128) bf16      b3_ref: (1, 128)   f32
    # o_ref : (TM, 128)  f32
    h = jnp.dot(x_ref[...], w1_ref[...], preferred_element_type=jnp.float32)
    h = jnp.maximum(h + b1_ref[...], 0.0)                       # Linear1 + BN1 + ReLU
    h = jnp.dot(h.astype(jnp.bfloat16), w2_ref[...],
                preferred_element_type=jnp.float32)
    h = jnp.maximum(h + b2_ref[...], 0.0)                       # Linear2 + BN2 + ReLU
    h = jnp.dot(h.astype(jnp.bfloat16), w3_ref[...],
                preferred_element_type=jnp.float32)
    o_ref[...] = h + b3_ref[...]                                # Linear3


def _fold_linear_bn(w, b, gamma, beta, mean, var, eps=BN_EPS):
    """Fold Linear(out,in) + BatchNorm1d(out) (inference) into (in,out) W, (out,) b."""
    g = gamma / jnp.sqrt(var + eps)
    w_eff = w.T * g[None, :]                   # (in, out), each column scaled
    b_eff = b * g + beta - mean * g
    return w_eff, b_eff


def mlp_latent_forward(feat,
                       w1, b1, g1, be1, m1, v1,
                       w2, b2, g2, be2, m2, v2,
                       w3, b3, *, tile_rows=256):
    """`x.view(-1, 512)` + `mlp_latent` of ResNet18Enc2 as one fused Pallas kernel.

    feat: (B, 512, 1, 1, 1) or (B, 512) backbone features (PyTorch layout).
    Returns: (B, 64) f32.
    """
    x = feat.reshape(-1, D_IN).astype(jnp.float32)               # x.view(-1, 512)
    B = x.shape[0]

    # ---- fold BN (eval mode) into the linears; pad last layer to 128 lanes ----
    w1e, b1e = _fold_linear_bn(w1, b1, g1, be1, m1, v1)          # (512,512), (512,)
    w2e, b2e = _fold_linear_bn(w2, b2, g2, be2, m2, v2)          # (512,128), (128,)
    w3e = jnp.pad(w3.T, ((0, 0), (0, D_OUTP - D_OUT)))           # (128,128)
    b3e = jnp.pad(b3, (0, D_OUTP - D_OUT))                       # (128,)

    # ---- batch tiling: pad rows to a sublane-friendly multiple of TM ----
    Bp = max(8, ((B + 7) // 8) * 8)
    TM = Bp if Bp <= tile_rows else tile_rows
    Bp = ((Bp + TM - 1) // TM) * TM
    xb = jnp.pad(x, ((0, Bp - B), (0, 0))).astype(jnp.bfloat16)

    out = pl.pallas_call(
        _mlp_head_kernel,
        out_shape=jax.ShapeDtypeStruct((Bp, D_OUTP), jnp.float32),
        grid_spec=pltpu.PrefetchScalarGridSpec(
            num_scalar_prefetch=0,
            grid=(Bp // TM,),
            in_specs=[
                pl.BlockSpec((TM, D_IN), lambda i: (i, 0)),       # activations
                pl.BlockSpec((D_IN, D_H1), lambda i: (0, 0)),     # W1 (resident)
                pl.BlockSpec((1, D_H1), lambda i: (0, 0)),        # b1
                pl.BlockSpec((D_H1, D_H2), lambda i: (0, 0)),     # W2 (resident)
                pl.BlockSpec((1, D_H2), lambda i: (0, 0)),        # b2
                pl.BlockSpec((D_H2, D_OUTP), lambda i: (0, 0)),   # W3 (resident)
                pl.BlockSpec((1, D_OUTP), lambda i: (0, 0)),      # b3
            ],
            out_specs=pl.BlockSpec((TM, D_OUTP), lambda i: (i, 0)),
        ),
        compiler_params=pltpu.CompilerParams(
            dimension_semantics=("parallel",)),
    )(xb,
      w1e.astype(jnp.bfloat16), b1e.reshape(1, -1).astype(jnp.float32),
      w2e.astype(jnp.bfloat16), b2e.reshape(1, -1).astype(jnp.float32),
      w3e.astype(jnp.bfloat16), b3e.reshape(1, -1).astype(jnp.float32))

    return out[:B, :D_OUT]


def _reference_forward(feat,
                       w1, b1, g1, be1, m1, v1,
                       w2, b2, g2, be2, m2, v2,
                       w3, b3):
    """Pure-JAX reference mimicking the kernel's bf16-MXU / f32-accum path."""
    def bf(a):
        return a.astype(jnp.bfloat16).astype(jnp.float32)

    x = feat.reshape(-1, D_IN).astype(jnp.float32)
    w1e, b1e = _fold_linear_bn(w1, b1, g1, be1, m1, v1)
    w2e, b2e = _fold_linear_bn(w2, b2, g2, be2, m2, v2)

    h = jnp.dot(bf(x), bf(w1e), precision=lax.Precision.HIGHEST) + b1e
    h = jnp.maximum(h, 0.0)
    h = jnp.dot(bf(h), bf(w2e), precision=lax.Precision.HIGHEST) + b2e
    h = jnp.maximum(h, 0.0)
    y = jnp.dot(bf(h), bf(w3.T), precision=lax.Precision.HIGHEST) + b3
    return y


if __name__ == "__main__":
    B = 2   # small batch; feature dims (512 -> 512 -> 128 -> 64) fixed by the module

    key = jax.random.PRNGKey(0)
    keys = jax.random.split(key, 16)

    # Backbone output features: (B, 512, 1, 1, 1), as fed into x.view(-1, 512).
    feat = jax.random.normal(keys[0], (B, D_IN, 1, 1, 1), dtype=jnp.float32)

    # mlp_latent parameters (PyTorch shapes), BatchNorm in eval mode.
    w1 = jax.random.normal(keys[1], (D_H1, D_IN), jnp.float32) * 0.04
    b1 = jax.random.normal(keys[2], (D_H1,), jnp.float32) * 0.1
    g1 = 1.0 + 0.2 * jax.random.normal(keys[3], (D_H1,), jnp.float32)
    be1 = jax.random.normal(keys[4], (D_H1,), jnp.float32) * 0.1
    m1 = jax.random.normal(keys[5], (D_H1,), jnp.float32) * 0.1
    v1 = 0.5 + jax.random.uniform(keys[6], (D_H1,), jnp.float32)

    w2 = jax.random.normal(keys[7], (D_H2, D_H1), jnp.float32) * 0.04
    b2 = jax.random.normal(keys[8], (D_H2,), jnp.float32) * 0.1
    g2 = 1.0 + 0.2 * jax.random.normal(keys[9], (D_H2,), jnp.float32)
    be2 = jax.random.normal(keys[10], (D_H2,), jnp.float32) * 0.1
    m2 = jax.random.normal(keys[11], (D_H2,), jnp.float32) * 0.1
    v2 = 0.5 + jax.random.uniform(keys[12], (D_H2,), jnp.float32)

    w3 = jax.random.normal(keys[13], (D_OUT, D_H2), jnp.float32) * 0.08
    b3 = jax.random.normal(keys[14], (D_OUT,), jnp.float32) * 0.1

    fwd = jax.jit(mlp_latent_forward)
    y = fwd(feat, w1, b1, g1, be1, m1, v1,
            w2, b2, g2, be2, m2, v2, w3, b3)
    jax.block_until_ready(y)

    assert y.shape == (B, D_OUT), y.shape

    ref = _reference_forward(feat, w1, b1, g1, be1, m1, v1,
                             w2, b2, g2, be2, m2, v2, w3, b3)
    err = float(jnp.max(jnp.abs(y - ref)))
    assert jnp.allclose(y, ref, atol=2e-3, rtol=2e-2), err

    print("KERNEL_OK")
</pallas_src>

<mosaic_0001>
module attributes {stable_mosaic.version = 11 : i64} {
  func.func @_mlp_head_kernel(%arg0: i32, %arg1: memref<8x512xbf16, #tpu.memory_space<vmem>>, %arg2: memref<512x512xbf16, #tpu.memory_space<vmem>>, %arg3: memref<1x512xf32, #tpu.memory_space<vmem>>, %arg4: memref<512x128xbf16, #tpu.memory_space<vmem>>, %arg5: memref<1x128xf32, #tpu.memory_space<vmem>>, %arg6: memref<128x128xbf16, #tpu.memory_space<vmem>>, %arg7: memref<1x128xf32, #tpu.memory_space<vmem>>, %arg8: memref<8x128xf32, #tpu.memory_space<vmem>>) attributes {dimension_semantics = [#tpu.dimension_semantics<parallel>], iteration_bounds = array<i64: 1>, scalar_prefetch = 0 : i64, scratch_operands = 0 : i64, tpu.core_type = #tpu.core_type<tc>, window_params = [{transform_indices = @transform_0, window_bounds = array<i64: 8, 512>}, {pipeline_mode = #tpu.pipeline_mode<synchronous>, transform_indices = @transform_1, window_bounds = array<i64: 512, 512>}, {pipeline_mode = #tpu.pipeline_mode<synchronous>, transform_indices = @transform_2, window_bounds = array<i64: 1, 512>}, {pipeline_mode = #tpu.pipeline_mode<synchronous>, transform_indices = @transform_3, window_bounds = array<i64: 512, 128>}, {pipeline_mode = #tpu.pipeline_mode<synchronous>, transform_indices = @transform_4, window_bounds = array<i64: 1, 128>}, {pipeline_mode = #tpu.pipeline_mode<synchronous>, transform_indices = @transform_5, window_bounds = array<i64: 128, 128>}, {pipeline_mode = #tpu.pipeline_mode<synchronous>, transform_indices = @transform_6, window_bounds = array<i64: 1, 128>}, {transform_indices = @transform_7, window_bounds = array<i64: 8, 128>}]} {
    %c0 = arith.constant 0 : index
    %c0_0 = arith.constant 0 : index
    %0 = vector.load %arg1[%c0, %c0_0] : memref<8x512xbf16, #tpu.memory_space<vmem>>, vector<8x512xbf16>
    %c0_1 = arith.constant 0 : index
    %c0_2 = arith.constant 0 : index
    %1 = vector.load %arg2[%c0_1, %c0_2] : memref<512x512xbf16, #tpu.memory_space<vmem>>, vector<512x512xbf16>
    %cst = arith.constant dense<0.000000e+00> : vector<8x512xf32>
    %2 = tpu.matmul %0, %1, %cst {dimension_numbers = #tpu.dot_dimension_numbers<[1], [0], [0], [1], [0, 0, 1, 1], [], []>} : vector<8x512xbf16>, vector<512x512xbf16>, vector<8x512xf32> -> vector<8x512xf32>
    %c0_3 = arith.constant 0 : index
    %c0_4 = arith.constant 0 : index
    %3 = vector.load %arg3[%c0_3, %c0_4] : memref<1x512xf32, #tpu.memory_space<vmem>>, vector<1x512xf32>
    %4 = vector.broadcast %3 : vector<1x512xf32> to vector<8x512xf32>
    %5 = arith.addf %2, %4 : vector<8x512xf32>
    %cst_5 = arith.constant 0.000000e+00 : f32
    %6 = vector.broadcast %cst_5 : f32 to vector<8x512xf32>
    %7 = arith.maximumf %5, %6 : vector<8x512xf32>
    %8 = arith.truncf %7 : vector<8x512xf32> to vector<8x512xbf16>
    %c0_6 = arith.constant 0 : index
    %c0_7 = arith.constant 0 : index
    %9 = vector.load %arg4[%c0_6, %c0_7] : memref<512x128xbf16, #tpu.memory_space<vmem>>, vector<512x128xbf16>
    %cst_8 = arith.constant dense<0.000000e+00> : vector<8x128xf32>
    %10 = tpu.matmul %8, %9, %cst_8 {dimension_numbers = #tpu.dot_dimension_numbers<[1], [0], [0], [1], [0, 0, 1, 1], [], []>} : vector<8x512xbf16>, vector<512x128xbf16>, vector<8x128xf32> -> vector<8x128xf32>
    %c0_9 = arith.constant 0 : index
    %c0_10 = arith.constant 0 : index
    %11 = vector.load %arg5[%c0_9, %c0_10] : memref<1x128xf32, #tpu.memory_space<vmem>>, vector<1x128xf32>
    %12 = vector.broadcast %11 : vector<1x128xf32> to vector<8x128xf32>
    %13 = arith.addf %10, %12 : vector<8x128xf32>
    %cst_11 = arith.constant 0.000000e+00 : f32
    %14 = vector.broadcast %cst_11 : f32 to vector<8x128xf32>
    %15 = arith.maximumf %13, %14 : vector<8x128xf32>
    %16 = arith.truncf %15 : vector<8x128xf32> to vector<8x128xbf16>
    %c0_12 = arith.constant 0 : index
    %c0_13 = arith.constant 0 : index
    %17 = vector.load %arg6[%c0_12, %c0_13] : memref<128x128xbf16, #tpu.memory_space<vmem>>, vector<128x128xbf16>
    %cst_14 = arith.constant dense<0.000000e+00> : vector<8x128xf32>
    %18 = tpu.matmul %16, %17, %cst_14 {dimension_numbers = #tpu.dot_dimension_numbers<[1], [0], [0], [1], [0, 0, 1, 1], [], []>} : vector<8x128xbf16>, vector<128x128xbf16>, vector<8x128xf32> -> vector<8x128xf32>
    %c0_15 = arith.constant 0 : index
    %c0_16 = arith.constant 0 : index
    %19 = vector.load %arg7[%c0_15, %c0_16] : memref<1x128xf32, #tpu.memory_space<vmem>>, vector<1x128xf32>
    %20 = vector.broadcast %19 : vector<1x128xf32> to vector<8x128xf32>
    %21 = arith.addf %18, %20 : vector<8x128xf32>
    %c0_17 = arith.constant 0 : index
    %c0_18 = arith.constant 0 : index
    %22 = vector.load %arg8[%c0_17, %c0_18] : memref<8x128xf32, #tpu.memory_space<vmem>>, vector<8x128xf32>
    tpu.vector_store %arg8[%c0_17, %c0_18], %21 {strides = array<i32>} : memref<8x128xf32, #tpu.memory_space<vmem>>, vector<8x128xf32>,
    return
  }
  func.func @transform_0(%arg0: i32) -> (i32, i32) {
    %c0_i32 = arith.constant 0 : i32
    %c0_i32_0 = arith.constant 0 : i32
    return %arg0, %c0_i32 : i32, i32
  }
  func.func @transform_1(%arg0: i32) -> (i32, i32) {
    %c0_i32 = arith.constant 0 : i32
    %c0_i32_0 = arith.constant 0 : i32
    %c0_i32_1 = arith.constant 0 : i32
    return %c0_i32, %c0_i32_0 : i32, i32
  }
  func.func @transform_2(%arg0: i32) -> (i32, i32) {
    %c0_i32 = arith.constant 0 : i32
    %c0_i32_0 = arith.constant 0 : i32
    %c0_i32_1 = arith.constant 0 : i32
    return %c0_i32, %c0_i32_0 : i32, i32
  }
  func.func @transform_3(%arg0: i32) -> (i32, i32) {
    %c0_i32 = arith.constant 0 : i32
    %c0_i32_0 = arith.constant 0 : i32
    %c0_i32_1 = arith.constant 0 : i32
    return %c0_i32, %c0_i32_0 : i32, i32
  }
  func.func @transform_4(%arg0: i32) -> (i32, i32) {
    %c0_i32 = arith.constant 0 : i32
    %c0_i32_0 = arith.constant 0 : i32
    %c0_i32_1 = arith.constant 0 : i32
    return %c0_i32, %c0_i32_0 : i32, i32
  }
  func.func @transform_5(%arg0: i32) -> (i32, i32) {
    %c0_i32 = arith.constant 0 : i32
    %c0_i32_0 = arith.constant 0 : i32
    %c0_i32_1 = arith.constant 0 : i32
    return %c0_i32, %c0_i32_0 : i32, i32
  }
  func.func @transform_6(%arg0: i32) -> (i32, i32) {
    %c0_i32 = arith.constant 0 : i32
    %c0_i32_0 = arith.constant 0 : i32
    %c0_i32_1 = arith.constant 0 : i32
    return %c0_i32, %c0_i32_0 : i32, i32
  }
  func.func @transform_7(%arg0: i32) -> (i32, i32) {
    %c0_i32 = arith.constant 0 : i32
    %c0_i32_0 = arith.constant 0 : i32
    return %arg0, %c0_i32 : i32, i32
  }
}

</mosaic_0001>

<bundles_post_ra>
// kernel: mlp_latent_forward.1
= control target key start
LH: loop header
LB: loop body
LE: loop exit
PB: predicated region body
PF: predicated region fallthrough
CT: control target
= control target key end

     0   :  { %vm1964_vm0 = vmmov 0   ;;  %s2533_s1 = inlined_call_operand.vmem [shape: bf16[512,512], index: 1, kind: input, shape index: {}]   ;;  %s2534_s0 = inlined_call_operand.vmem [shape: bf16[8,512], index: 0, kind: input, shape index: {}]   ;;  %s2535_s3 = inlined_call_operand.vmem [shape: bf16[512,128], index: 3, kind: input, shape index: {}]   ;;  %s2536_s5 = inlined_call_operand.vmem [shape: bf16[128,128], index: 5, kind: input, shape index: {}]   ;;  %s2537_s2 = inlined_call_operand.vmem [shape: f32[1,512], index: 2, kind: input, shape index: {}]   ;;  %s2538_s4 = inlined_call_operand.vmem [shape: f32[1,128], index: 4, kind: input, shape index: {}]   ;;  %s2539_s6 = inlined_call_operand.vmem [shape: f32[1,128], index: 6, kind: input, shape index: {}]   ;;  %s2540_s7 = inlined_call_operand.vmem [shape: f32[8,128], index: 7, kind: output, shape index: {}]  }
   0x1   :  { %v1727_v0 = vld [vmem:[%s2533_s1 + $0x4] ss:$16 sps:$4 sm:$0xff]   ;;  %v1729_v1 = vld [vmem:[%s2533_s1 + $0xc] ss:$16 sps:$4 sm:$0xff]   ;;  %v1731_v2 = vld [vmem:[%s2533_s1] ss:$16 sps:$4 sm:$0xff]  }
   0x2   :  { %833 = vmatprep.subr.bf16.mxu0 %v1727_v0  ;;  %v1732_v3 = vld [vmem:[%s2533_s1 + $0x8] ss:$16 sps:$4 sm:$0xff]   ;;  %915 = vmatprep.subr.bf16.mxu1 %v1729_v1  ;;  %v1733_v4 = vld [vmem:[%s2533_s1 + $0x24] ss:$16 sps:$4 sm:$0xff]   ;;  %v1735_v5 = vld [vmem:[%s2533_s1 + $0x2c] ss:$16 sps:$4 sm:$0xff]  }
   0x3   :  { %834 = vmatpush1.bf16.msra.mxu0 %v1731_v2  ;;  %916 = vmatpush1.bf16.msra.mxu1 %v1732_v3  ;;  %v1737_v6 = vld [vmem:[%s2533_s1 + $0x20] ss:$16 sps:$4 sm:$0xff]   ;;  %v1738_v7 = vld [vmem:[%s2533_s1 + $0x28] ss:$16 sps:$4 sm:$0xff]   ;;  %v1739_v8 = vld [vmem:[%s2533_s1 + $0x44] ss:$16 sps:$4 sm:$0xff]  }
   0x4   :  { %835 = vmatprep.subr.bf16.mxu0 %v1733_v4  ;;  %917 = vmatprep.subr.bf16.mxu1 %v1735_v5  ;;  %v1741_v9 = vld [vmem:[%s2533_s1 + $0x4c] ss:$16 sps:$4 sm:$0xff]   ;;  %v1743_v10 = vld [vmem:[%s2533_s1 + $0x40] ss:$16 sps:$4 sm:$0xff]   ;;  %v1744_v11 = vld [vmem:[%s2533_s1 + $0x48] ss:$16 sps:$4 sm:$0xff]  }
   0x5   :  { %v1745_v12 = vld [vmem:[%s2533_s1 + $0x64] ss:$16 sps:$4 sm:$0xff]   ;;  %v1747_v13 = vld [vmem:[%s2533_s1 + $0x6c] ss:$16 sps:$4 sm:$0xff]   ;;  %v1749_v14 = vld [vmem:[%s2533_s1 + $0x60] ss:$16 sps:$4 sm:$0xff]  }
   0x6   :  { %v1750_v15 = vld [vmem:[%s2533_s1 + $0x68] ss:$16 sps:$4 sm:$0xff]   ;;  %v1751_v16 = vld [vmem:[%s2533_s1 + $0x84] ss:$16 sps:$4 sm:$0xff]   ;;  %v1753_v17 = vld [vmem:[%s2533_s1 + $0x8c] ss:$16 sps:$4 sm:$0xff]  }
   0x7   :  { %836 = vmatpush1.bf16.msra.mxu0 %v1737_v6  ;;  %918 = vmatpush1.bf16.msra.mxu1 %v1738_v7  ;;  %v1755_v18 = vld [vmem:[%s2533_s1 + $0x80] ss:$16 sps:$4 sm:$0xff]   ;;  %v1756_v19 = vld [vmem:[%s2533_s1 + $0x88] ss:$16 sps:$4 sm:$0xff]   ;;  %v1757_v20 = vld [vmem:[%s2533_s1 + $0xa4] ss:$16 sps:$4 sm:$0xff]  }
   0x8   :  { %837 = vmatprep.subr.bf16.mxu0 %v1739_v8  ;;  %919 = vmatprep.subr.bf16.mxu1 %v1741_v9  ;;  %v1759_v21 = vld [vmem:[%s2533_s1 + $0xac] ss:$16 sps:$4 sm:$0xff]   ;;  %v1761_v22 = vld [vmem:[%s2533_s1 + $0xa0] ss:$16 sps:$4 sm:$0xff]   ;;  %v1762_v23 = vld [vmem:[%s2533_s1 + $0xa8] ss:$16 sps:$4 sm:$0xff]  }
   0x9   :  { %v1763_v24 = vld [vmem:[%s2533_s1 + $0xc4] ss:$16 sps:$4 sm:$0xff]   ;;  %v1765_v25 = vld [vmem:[%s2533_s1 + $0xcc] ss:$16 sps:$4 sm:$0xff]   ;;  %v1767_v26 = vld [vmem:[%s2533_s1 + $0xc0] ss:$16 sps:$4 sm:$0xff]  }
   0xa   :  { %v1768_v27 = vld [vmem:[%s2533_s1 + $0xc8] ss:$16 sps:$4 sm:$0xff]   ;;  %v1769_v28 = vld [vmem:[%s2533_s1 + $0xe4] ss:$16 sps:$4 sm:$0xff]   ;;  %v1771_v29 = vld [vmem:[%s2533_s1 + $0xec] ss:$16 sps:$4 sm:$0xff]  }
   0xb   :  { %838 = vmatpush1.bf16.msra.mxu0 %v1743_v10  ;;  %920 = vmatpush1.bf16.msra.mxu1 %v1744_v11  ;;  %v1773_v30 = vld [vmem:[%s2533_s1 + $0xe0] ss:$16 sps:$4 sm:$0xff]   ;;  %v1774_v31 = vld [vmem:[%s2533_s1 + $0xe8] ss:$16 sps:$4 sm:$0xff]   ;;  %v1775_v32 = vld [vmem:[%s2533_s1 + $0x104] ss:$16 sps:$4 sm:$0xff]  }
   0xc   :  { %839 = vmatprep.subr.bf16.mxu0 %v1745_v12  ;;  %921 = vmatprep.subr.bf16.mxu1 %v1747_v13  ;;  %v1777_v33 = vld [vmem:[%s2533_s1 + $0x10c] ss:$16 sps:$4 sm:$0xff]   ;;  %v1779_v34 = vld [vmem:[%s2533_s1 + $0x100] ss:$16 sps:$4 sm:$0xff]   ;;  %v1780_v35 = vld [vmem:[%s2533_s1 + $0x108] ss:$16 sps:$4 sm:$0xff]  }
   0xd   :  { %v1781_v36 = vld [vmem:[%s2533_s1 + $0x124] ss:$16 sps:$4 sm:$0xff]   ;;  %v1783_v37 = vld [vmem:[%s2533_s1 + $0x12c] ss:$16 sps:$4 sm:$0xff]   ;;  %v1785_v38 = vld [vmem:[%s2533_s1 + $0x120] ss:$16 sps:$4 sm:$0xff]  }
   0xe   :  { %v1786_v39 = vld [vmem:[%s2533_s1 + $0x128] ss:$16 sps:$4 sm:$0xff]   ;;  %v1787_v40 = vld [vmem:[%s2533_s1 + $0x144] ss:$16 sps:$4 sm:$0xff]   ;;  %v1789_v41 = vld [vmem:[%s2533_s1 + $0x14c] ss:$16 sps:$4 sm:$0xff]  }
   0xf   :  { %840 = vmatpush1.bf16.msra.mxu0 %v1749_v14  ;;  %922 = vmatpush1.bf16.msra.mxu1 %v1750_v15  ;;  %v1791_v42 = vld [vmem:[%s2533_s1 + $0x140] ss:$16 sps:$4 sm:$0xff]   ;;  %v1792_v43 = vld [vmem:[%s2533_s1 + $0x148] ss:$16 sps:$4 sm:$0xff]   ;;  %v1793_v44 = vld [vmem:[%s2533_s1 + $0x164] ss:$16 sps:$4 sm:$0xff]  }
  0x10   :  { %841 = vmatprep.subr.bf16.mxu0 %v1751_v16  ;;  %923 = vmatprep.subr.bf16.mxu1 %v1753_v17  ;;  %v1795_v45 = vld [vmem:[%s2533_s1 + $0x16c] ss:$16 sps:$4 sm:$0xff]   ;;  %v27_v46 = vld [vmem:[%s2534_s0] sm:$0xff]  ;;  %v1798_v49 = vld [vmem:[%s2533_s1 + $0x168] ss:$16 sps:$4 sm:$0xff]  }
  0x11   :  { %v1467_v47 = vcombine.high %v27_v46, %v27_v46  ;;  %v1797_v48 = vld [vmem:[%s2533_s1 + $0x160] ss:$16 sps:$4 sm:$0xff]   ;;  %v1799_v50 = vld [vmem:[%s2533_s1 + $0x184] ss:$16 sps:$4 sm:$0xff]   ;;  %v1801_v51 = vld [vmem:[%s2533_s1 + $0x18c] ss:$16 sps:$4 sm:$0xff]   ;;  %v1466_v5 = vcombine.low %v27_v46, %v27_v46 }
  0x12   :  { %v1803_v52 = vld [vmem:[%s2533_s1 + $0x180] ss:$16 sps:$4 sm:$0xff]   ;;  %v1804_v53 = vld [vmem:[%s2533_s1 + $0x188] ss:$16 sps:$4 sm:$0xff]   ;;  %v1805_v54 = vld [vmem:[%s2533_s1 + $0x1a4] ss:$16 sps:$4 sm:$0xff]  }
  0x13   :  { %842 = vmatpush1.bf16.msra.mxu0 %v1755_v18  ;;  %924 = vmatpush1.bf16.msra.mxu1 %v1756_v19  ;;  %v1807_v55 = vld [vmem:[%s2533_s1 + $0x1ac] ss:$16 sps:$4 sm:$0xff]   ;;  %v1809_v56 = vld [vmem:[%s2533_s1 + $0x1a0] ss:$16 sps:$4 sm:$0xff]   ;;  %v1810_v57 = vld [vmem:[%s2533_s1 + $0x1a8] ss:$16 sps:$4 sm:$0xff]  }
  0x14   :  { %843 = vmatprep.subr.bf16.mxu0 %v1757_v20  ;;  %925 = vmatprep.subr.bf16.mxu1 %v1759_v21  ;;  %v1811_v58 = vld [vmem:[%s2533_s1 + $0x1c4] ss:$16 sps:$4 sm:$0xff]   ;;  %v1813_v59 = vld [vmem:[%s2533_s1 + $0x1cc] ss:$16 sps:$4 sm:$0xff]   ;;  %v1815_v60 = vld [vmem:[%s2533_s1 + $0x1c0] ss:$16 sps:$4 sm:$0xff]  }
  0x15   :  { %865 = vmatprep.mubr.bf16.mxu0 %v1467_v47  ;;  %947 = vmatprep.mubr.bf16.mxu1 %v1467_v47  ;;  %v1816_v61 = vld [vmem:[%s2533_s1 + $0x1c8] ss:$16 sps:$4 sm:$0xff]   ;;  %v1817_v62 = vld [vmem:[%s2533_s1 + $0x1e4] ss:$16 sps:$4 sm:$0xff]   ;;  %v1819_v63 = vld [vmem:[%s2533_s1 + $0x1ec] ss:$16 sps:$4 sm:$0xff]  }
  0x16   :  { %v1821_v0 = vld [vmem:[%s2533_s1 + $0x1e0] ss:$16 sps:$4 sm:$0xff]   ;;  %v1822_v1 = vld [vmem:[%s2533_s1 + $0x1e8] ss:$16 sps:$4 sm:$0xff]   ;;  %v1828_v2 = vld [vmem:[%s2533_s1 + $0x204] ss:$16 sps:$4 sm:$0xff]  }
  0x17   :  { %844 = vmatpush1.bf16.msra.mxu0 %v1761_v22  ;;  %926 = vmatpush1.bf16.msra.mxu1 %v1762_v23  ;;  %v1831_v3 = vld [vmem:[%s2533_s1 + $0x20c] ss:$16 sps:$4 sm:$0xff]   ;;  %v1826_v6 = vld [vmem:[%s2533_s1 + $0x200] ss:$16 sps:$4 sm:$0xff]   ;;  %v1829_v7 = vld [vmem:[%s2533_s1 + $0x208] ss:$16 sps:$4 sm:$0xff]  }
  0x18   :  { %845 = vmatprep.subr.bf16.mxu0 %v1763_v24  ;;  %927 = vmatprep.subr.bf16.mxu1 %v1765_v25  ;;  %v2209_v4 = vld [vmem:[%s2534_s0 + $0x8] sm:$0xff]  ;;  %v1834_v8 = vld [vmem:[%s2533_s1 + $0x224] ss:$16 sps:$4 sm:$0xff]   ;;  %v1832_v11 = vld [vmem:[%s2533_s1 + $0x220] ss:$16 sps:$4 sm:$0xff]  }
  0x19   :  { %v1837_v9 = vld [vmem:[%s2533_s1 + $0x22c] ss:$16 sps:$4 sm:$0xff]   ;;  %v1469_v10 = vcombine.high %v2209_v4, %v2209_v4  ;;  %v1835_v12 = vld [vmem:[%s2533_s1 + $0x228] ss:$16 sps:$4 sm:$0xff]   ;;  %v1840_v13 = vld [vmem:[%s2533_s1 + $0x244] ss:$16 sps:$4 sm:$0xff]  }
  0x1a   :  { %v1843_v14 = vld [vmem:[%s2533_s1 + $0x24c] ss:$16 sps:$4 sm:$0xff]   ;;  %v1838_v15 = vld [vmem:[%s2533_s1 + $0x240] ss:$16 sps:$4 sm:$0xff]   ;;  %v1841_v16 = vld [vmem:[%s2533_s1 + $0x248] ss:$16 sps:$4 sm:$0xff]  }
  0x1b   :  { %846 = vmatpush1.bf16.msra.mxu0 %v1767_v26  ;;  %928 = vmatpush1.bf16.msra.mxu1 %v1768_v27  ;;  %v1846_v17 = vld [vmem:[%s2533_s1 + $0x264] ss:$16 sps:$4 sm:$0xff]   ;;  %v1849_v18 = vld [vmem:[%s2533_s1 + $0x26c] ss:$16 sps:$4 sm:$0xff]   ;;  %v1844_v19 = vld [vmem:[%s2533_s1 + $0x260] ss:$16 sps:$4 sm:$0xff]  }
  0x1c   :  { %847 = vmatprep.subr.bf16.mxu0 %v1769_v28  ;;  %929 = vmatprep.subr.bf16.mxu1 %v1771_v29  ;;  %v1847_v20 = vld [vmem:[%s2533_s1 + $0x268] ss:$16 sps:$4 sm:$0xff]   ;;  %v1852_v21 = vld [vmem:[%s2533_s1 + $0x284] ss:$16 sps:$4 sm:$0xff]   ;;  %v1855_v22 = vld [vmem:[%s2533_s1 + $0x28c] ss:$16 sps:$4 sm:$0xff]  }
  0x1d   :  { %v1850_v23 = vld [vmem:[%s2533_s1 + $0x280] ss:$16 sps:$4 sm:$0xff]   ;;  %v1853_v24 = vld [vmem:[%s2533_s1 + $0x288] ss:$16 sps:$4 sm:$0xff]   ;;  %v1858_v25 = vld [vmem:[%s2533_s1 + $0x2a4] ss:$16 sps:$4 sm:$0xff]  }
  0x1e   :  { %v1861_v26 = vld [vmem:[%s2533_s1 + $0x2ac] ss:$16 sps:$4 sm:$0xff]   ;;  %v1856_v27 = vld [vmem:[%s2533_s1 + $0x2a0] ss:$16 sps:$4 sm:$0xff]   ;;  %v1859_v28 = vld [vmem:[%s2533_s1 + $0x2a8] ss:$16 sps:$4 sm:$0xff]  }
  0x1f   :  { %848 = vmatpush1.bf16.msra.mxu0 %v1773_v30  ;;  %930 = vmatpush1.bf16.msra.mxu1 %v1774_v31  ;;  %v1864_v29 = vld [vmem:[%s2533_s1 + $0x2c4] ss:$16 sps:$4 sm:$0xff]   ;;  %v1867_v30 = vld [vmem:[%s2533_s1 + $0x2cc] ss:$16 sps:$4 sm:$0xff]   ;;  %v1862_v31 = vld [vmem:[%s2533_s1 + $0x2c0] ss:$16 sps:$4 sm:$0xff]  }
  0x20   :  { %849 = vmatprep.subr.bf16.mxu0 %v1775_v32  ;;  %931 = vmatprep.subr.bf16.mxu1 %v1777_v33  ;;  %v1865_v32 = vld [vmem:[%s2533_s1 + $0x2c8] ss:$16 sps:$4 sm:$0xff]   ;;  %v1870_v33 = vld [vmem:[%s2533_s1 + $0x2e4] ss:$16 sps:$4 sm:$0xff]   ;;  %v1891_v46 = vld [vmem:[%s2533_s1 + $0x34c] ss:$16 sps:$4 sm:$0xff]  }
  0x21   :  { %v1886_v47 = vld [vmem:[%s2533_s1 + $0x340] ss:$16 sps:$4 sm:$0xff]  }
  0x23   :  { %850 = vmatpush1.bf16.msra.mxu0 %v1779_v34  ;;  %932 = vmatpush1.bf16.msra.mxu1 %v1780_v35  ;;  %v1873_v34 = vld [vmem:[%s2533_s1 + $0x2ec] ss:$16 sps:$4 sm:$0xff]   ;;  %v1868_v35 = vld [vmem:[%s2533_s1 + $0x2e0] ss:$16 sps:$4 sm:$0xff]  }
  0x24   :  { %851 = vmatprep.subr.bf16.mxu0 %v1781_v36  ;;  %933 = vmatprep.subr.bf16.mxu1 %v1783_v37  ;;  %v1871_v36 = vld [vmem:[%s2533_s1 + $0x2e8] ss:$16 sps:$4 sm:$0xff]   ;;  %v1876_v37 = vld [vmem:[%s2533_s1 + $0x304] ss:$16 sps:$4 sm:$0xff]  }
  0x27   :  { %852 = vmatpush1.bf16.msra.mxu0 %v1785_v38  ;;  %934 = vmatpush1.bf16.msra.mxu1 %v1786_v39  ;;  %v1879_v38 = vld [vmem:[%s2533_s1 + $0x30c] ss:$16 sps:$4 sm:$0xff]   ;;  %v1874_v39 = vld [vmem:[%s2533_s1 + $0x300] ss:$16 sps:$4 sm:$0xff]  }
  0x28   :  { %853 = vmatprep.subr.bf16.mxu0 %v1787_v40  ;;  %935 = vmatprep.subr.bf16.mxu1 %v1789_v41  ;;  %v1877_v40 = vld [vmem:[%s2533_s1 + $0x308] ss:$16 sps:$4 sm:$0xff]   ;;  %v1882_v41 = vld [vmem:[%s2533_s1 + $0x324] ss:$16 sps:$4 sm:$0xff]  }
  0x2b   :  { %854 = vmatpush1.bf16.msra.mxu0 %v1791_v42  ;;  %936 = vmatpush1.bf16.msra.mxu1 %v1792_v43  ;;  %v1885_v42 = vld [vmem:[%s2533_s1 + $0x32c] ss:$16 sps:$4 sm:$0xff]   ;;  %v1880_v43 = vld [vmem:[%s2533_s1 + $0x320] ss:$16 sps:$4 sm:$0xff]  }
  0x2c   :  { %855 = vmatprep.subr.bf16.mxu0 %v1793_v44  ;;  %937 = vmatprep.subr.bf16.mxu1 %v1795_v45  ;;  %v1883_v44 = vld [vmem:[%s2533_s1 + $0x328] ss:$16 sps:$4 sm:$0xff]   ;;  %v1888_v45 = vld [vmem:[%s2533_s1 + $0x344] ss:$16 sps:$4 sm:$0xff]  }
  0x2f   :  { %856 = vmatpush1.bf16.msra.mxu0 %v1797_v48  ;;  %938 = vmatpush1.bf16.msra.mxu1 %v1798_v49  ;;  %v1889_v48 = vld [vmem:[%s2533_s1 + $0x348] ss:$16 sps:$4 sm:$0xff]   ;;  %v1894_v49 = vld [vmem:[%s2533_s1 + $0x364] ss:$16 sps:$4 sm:$0xff]  }
  0x30   :  { %857 = vmatprep.subr.bf16.mxu0 %v1799_v50  ;;  %939 = vmatprep.subr.bf16.mxu1 %v1801_v51  ;;  %v1897_v50 = vld [vmem:[%s2533_s1 + $0x36c] ss:$16 sps:$4 sm:$0xff]   ;;  %v1892_v51 = vld [vmem:[%s2533_s1 + $0x360] ss:$16 sps:$4 sm:$0xff]  }
  0x33   :  { %858 = vmatpush1.bf16.msra.mxu0 %v1803_v52  ;;  %940 = vmatpush1.bf16.msra.mxu1 %v1804_v53  ;;  %v1895_v52 = vld [vmem:[%s2533_s1 + $0x368] ss:$16 sps:$4 sm:$0xff]   ;;  %v1900_v53 = vld [vmem:[%s2533_s1 + $0x384] ss:$16 sps:$4 sm:$0xff]  }
  0x34   :  { %859 = vmatprep.subr.bf16.mxu0 %v1805_v54  ;;  %941 = vmatprep.subr.bf16.mxu1 %v1807_v55  ;;  %v1903_v54 = vld [vmem:[%s2533_s1 + $0x38c] ss:$16 sps:$4 sm:$0xff]   ;;  %v1898_v55 = vld [vmem:[%s2533_s1 + $0x380] ss:$16 sps:$4 sm:$0xff]  }
  0x37   :  { %860 = vmatpush1.bf16.msra.mxu0 %v1809_v56  ;;  %942 = vmatpush1.bf16.msra.mxu1 %v1810_v57  ;;  %v1901_v56 = vld [vmem:[%s2533_s1 + $0x388] ss:$16 sps:$4 sm:$0xff]   ;;  %v1906_v57 = vld [vmem:[%s2533_s1 + $0x3a4] ss:$16 sps:$4 sm:$0xff]  }
  0x38   :  { %861 = vmatprep.subr.bf16.mxu0 %v1811_v58  ;;  %943 = vmatprep.subr.bf16.mxu1 %v1813_v59  ;;  %v1909_v58 = vld [vmem:[%s2533_s1 + $0x3ac] ss:$16 sps:$4 sm:$0xff]   ;;  %v1904_v59 = vld [vmem:[%s2533_s1 + $0x3a0] ss:$16 sps:$4 sm:$0xff]  }
  0x3b   :  { %862 = vmatpush1.bf16.msra.mxu0 %v1815_v60  ;;  %944 = vmatpush1.bf16.msra.mxu1 %v1816_v61  ;;  %v1907_v60 = vld [vmem:[%s2533_s1 + $0x3a8] ss:$16 sps:$4 sm:$0xff]   ;;  %v1912_v61 = vld [vmem:[%s2533_s1 + $0x3c4] ss:$16 sps:$4 sm:$0xff]  }
  0x3c   :  { %863 = vmatprep.subr.bf16.mxu0 %v1817_v62  ;;  %945 = vmatprep.subr.bf16.mxu1 %v1819_v63  ;;  %v1915_v62 = vld [vmem:[%s2533_s1 + $0x3cc] ss:$16 sps:$4 sm:$0xff]   ;;  %v1910_v63 = vld [vmem:[%s2533_s1 + $0x3c0] ss:$16 sps:$4 sm:$0xff]  }
  0x3f   :  { %864 = vmatpush1.bf16.msra.mxu0 %v1821_v0  ;;  %946 = vmatpush1.bf16.msra.mxu1 %v1822_v1  ;;  %v1913_v0 = vld [vmem:[%s2533_s1 + $0x3c8] ss:$16 sps:$4 sm:$0xff]   ;;  %v1918_v1 = vld [vmem:[%s2533_s1 + $0x3e4] ss:$16 sps:$4 sm:$0xff]  }
  0x40   :  { %874 = vmatprep.subr.bf16.mxu0 %v1828_v2  ;;  %956 = vmatprep.subr.bf16.mxu1 %v1831_v3  ;;  %v1921_v2 = vld [vmem:[%s2533_s1 + $0x3ec] ss:$16 sps:$4 sm:$0xff]   ;;  %v1916_v3 = vld [vmem:[%s2533_s1 + $0x3e0] ss:$16 sps:$4 sm:$0xff]  }
  0x42   :  { %866 = vmatmul.mubr.bf16.vlgmr.msra.gmra.mrb[0].mxu0 %v1466_v5  ;;  %948 = vmatmul.mubr.bf16.vlgmr.msra.gmra.mrb[0].mxu1 %v1466_v5  ;;  %v1919_v5 = vld [vmem:[%s2533_s1 + $0x3e8] ss:$16 sps:$4 sm:$0xff]  }
  0x43   :  { %875 = vmatpush1.bf16.msra.mxu0 %v1826_v6  ;;  %957 = vmatpush1.bf16.msra.mxu1 %v1829_v7  ;;  %v1923_v6 = vld [vmem:[%s2535_s3 + $0x40] sm:$0xff]  }
  0x44   :  { %876 = vmatprep.subr.bf16.mxu0 %v1834_v8  ;;  %958 = vmatprep.subr.bf16.mxu1 %v1837_v9  ;;  %v1924_v7 = vld [vmem:[%s2535_s3 + $0xc0] sm:$0xff]   ;;  %v1468_v8 = vcombine.low %v2209_v4, %v2209_v4  ;;  %v1928_v4 = vld [vmem:[%s2535_s3 + $0xc8] sm:$0xff]  }
  0x45   :  { %906 = vmatprep.mubr.bf16.mxu0 %v1469_v10  ;;  %988 = vmatprep.mubr.bf16.mxu1 %v1469_v10  ;;  %v1925_v9 = vld [vmem:[%s2535_s3] sm:$0xff]  }
  0x46   :  { %v1926_v10 = vld [vmem:[%s2535_s3 + $0x80] sm:$0xff]  }
  0x47   :  { %877 = vmatpush1.bf16.msra.mxu0 %v1832_v11  ;;  %959 = vmatpush1.bf16.msra.mxu1 %v1835_v12  ;;  %v1927_v11 = vld [vmem:[%s2535_s3 + $0x48] sm:$0xff]  }
  0x48   :  { %878 = vmatprep.subr.bf16.mxu0 %v1840_v13  ;;  %960 = vmatprep.subr.bf16.mxu1 %v1843_v14  ;;  %v1929_v12 = vld [vmem:[%s2535_s3 + $0x8] sm:$0xff]   ;;  %v1931_v14 = vld [vmem:[%s2535_s3 + $0x50] sm:$0xff]  }
  0x49   :  { %v1930_v13 = vld [vmem:[%s2535_s3 + $0x88] sm:$0xff]  }
  0x4b   :  { %879 = vmatpush1.bf16.msra.mxu0 %v1838_v15  ;;  %961 = vmatpush1.bf16.msra.mxu1 %v1841_v16  ;;  %v1932_v15 = vld [vmem:[%s2535_s3 + $0xd0] sm:$0xff]  }
  0x4c   :  { %880 = vmatprep.subr.bf16.mxu0 %v1846_v17  ;;  %962 = vmatprep.subr.bf16.mxu1 %v1849_v18  ;;  %v1933_v16 = vld [vmem:[%s2535_s3 + $0x10] sm:$0xff]   ;;  %v1935_v18 = vld [vmem:[%s2535_s3 + $0x58] sm:$0xff]  }
  0x4d   :  { %v1934_v17 = vld [vmem:[%s2535_s3 + $0x90] sm:$0xff]  }
  0x4f   :  { %881 = vmatpush1.bf16.msra.mxu0 %v1844_v19  ;;  %963 = vmatpush1.bf16.msra.mxu1 %v1847_v20  ;;  %v1936_v19 = vld [vmem:[%s2535_s3 + $0xd8] sm:$0xff]  }
  0x50   :  { %882 = vmatprep.subr.bf16.mxu0 %v1852_v21  ;;  %964 = vmatprep.subr.bf16.mxu1 %v1855_v22  ;;  %v1937_v20 = vld [vmem:[%s2535_s3 + $0x18] sm:$0xff]   ;;  %v1939_v22 = vld [vmem:[%s2535_s3 + $0x60] sm:$0xff]  }
  0x51   :  { %v1938_v21 = vld [vmem:[%s2535_s3 + $0x98] sm:$0xff]  }
  0x53   :  { %883 = vmatpush1.bf16.msra.mxu0 %v1850_v23  ;;  %965 = vmatpush1.bf16.msra.mxu1 %v1853_v24  ;;  %v1940_v23 = vld [vmem:[%s2535_s3 + $0xe0] sm:$0xff]  }
  0x54   :  { %884 = vmatprep.subr.bf16.mxu0 %v1858_v25  ;;  %966 = vmatprep.subr.bf16.mxu1 %v1861_v26  ;;  %v1941_v24 = vld [vmem:[%s2535_s3 + $0x20] sm:$0xff]   ;;  %v1943_v26 = vld [vmem:[%s2535_s3 + $0x68] sm:$0xff]  }
  0x55   :  { %v1942_v25 = vld [vmem:[%s2535_s3 + $0xa0] sm:$0xff]  }
  0x57   :  { %885 = vmatpush1.bf16.msra.mxu0 %v1856_v27  ;;  %967 = vmatpush1.bf16.msra.mxu1 %v1859_v28  ;;  %v1944_v27 = vld [vmem:[%s2535_s3 + $0xe8] sm:$0xff]  }
  0x58   :  { %886 = vmatprep.subr.bf16.mxu0 %v1864_v29  ;;  %968 = vmatprep.subr.bf16.mxu1 %v1867_v30  ;;  %v1945_v28 = vld [vmem:[%s2535_s3 + $0x28] sm:$0xff]   ;;  %v1947_v30 = vld [vmem:[%s2535_s3 + $0x70] sm:$0xff]  }
  0x59   :  { %v1946_v29 = vld [vmem:[%s2535_s3 + $0xa8] sm:$0xff]  }
  0x5b   :  { %887 = vmatpush1.bf16.msra.mxu0 %v1862_v31  ;;  %969 = vmatpush1.bf16.msra.mxu1 %v1865_v32  ;;  %v1948_v31 = vld [vmem:[%s2535_s3 + $0xf0] sm:$0xff]  }
  0x5c   :  { %888 = vmatprep.subr.bf16.mxu0 %v1870_v33  ;;  %970 = vmatprep.subr.bf16.mxu1 %v1873_v34  ;;  %v1949_v32 = vld [vmem:[%s2535_s3 + $0x30] sm:$0xff]   ;;  %v1951_v34 = vld [vmem:[%s2535_s3 + $0x78] sm:$0xff]  }
  0x5d   :  { %v1950_v33 = vld [vmem:[%s2535_s3 + $0xb0] sm:$0xff]  }
  0x5f   :  { %889 = vmatpush1.bf16.msra.mxu0 %v1868_v35  ;;  %971 = vmatpush1.bf16.msra.mxu1 %v1871_v36  ;;  %v1952_v35 = vld [vmem:[%s2535_s3 + $0xf8] sm:$0xff]  }
  0x60   :  { %890 = vmatprep.subr.bf16.mxu0 %v1876_v37  ;;  %972 = vmatprep.subr.bf16.mxu1 %v1879_v38  ;;  %v1953_v36 = vld [vmem:[%s2535_s3 + $0x38] sm:$0xff]   ;;  %v1963_v38 = vmov 0.0  }
  0x61   :  { %v1954_v37 = vld [vmem:[%s2535_s3 + $0xb8] sm:$0xff]  }
  0x63   :  { %891 = vmatpush1.bf16.msra.mxu0 %v1874_v39  ;;  %973 = vmatpush1.bf16.msra.mxu1 %v1877_v40  ;;  %v159_v39 = vlaneseq }
  0x64   :  { %892 = vmatprep.subr.bf16.mxu0 %v1882_v41  ;;  %974 = vmatprep.subr.bf16.mxu1 %v1885_v42 }
  0x65   :  { %v160_v40 = vshrl.u32 %v159_v39, 7 }
  0x67   :  { %893 = vmatpush1.bf16.msra.mxu0 %v1880_v43  ;;  %975 = vmatpush1.bf16.msra.mxu1 %v1883_v44  ;;  %v161_v41 = vsub.s32 0, %v160_v40  ;;  %v169_v42 = vsub.s32 2, %v160_v40  ;;  %v157_v43 = vld [vmem:[%s2537_s2] sm:$0xf]  ;;  %v165_v44 = vsub.s32 1, %v160_v40 }
  0x68   :  { %894 = vmatprep.subr.bf16.mxu0 %v1888_v45  ;;  %976 = vmatprep.subr.bf16.mxu1 %v1891_v46  ;;  %v173_v45 = vsub.s32 3, %v160_v40 }
  0x69   :  { %v162_v46 = vrot.slane %v157_v43, %v161_v41 }
  0x6b   :  { %895 = vmatpush1.bf16.msra.mxu0 %v1886_v47  ;;  %977 = vmatpush1.bf16.msra.mxu1 %v1889_v48  ;;  %v170_v47 = vrot.slane %v157_v43, %v169_v42  ;;  %v166_v48 = vrot.slane %v157_v43, %v165_v44 }
  0x6c   :  { %896 = vmatprep.subr.bf16.mxu0 %v1894_v49  ;;  %978 = vmatprep.subr.bf16.mxu1 %v1897_v50  ;;  %v174_v49 = vrot.slane %v157_v43, %v173_v45 }
  0x6f   :  { %897 = vmatpush1.bf16.msra.mxu0 %v1892_v51  ;;  %979 = vmatpush1.bf16.msra.mxu1 %v1895_v52 }
  0x70   :  { %898 = vmatprep.subr.bf16.mxu0 %v1900_v53  ;;  %980 = vmatprep.subr.bf16.mxu1 %v1903_v54 }
  0x73   :  { %899 = vmatpush1.bf16.msra.mxu0 %v1898_v55  ;;  %981 = vmatpush1.bf16.msra.mxu1 %v1901_v56 }
  0x74   :  { %900 = vmatprep.subr.bf16.mxu0 %v1906_v57  ;;  %982 = vmatprep.subr.bf16.mxu1 %v1909_v58 }
  0x77   :  { %901 = vmatpush1.bf16.msra.mxu0 %v1904_v59  ;;  %983 = vmatpush1.bf16.msra.mxu1 %v1907_v60 }
  0x78   :  { %902 = vmatprep.subr.bf16.mxu0 %v1912_v61  ;;  %984 = vmatprep.subr.bf16.mxu1 %v1915_v62 }
  0x7b   :  { %903 = vmatpush1.bf16.msra.mxu0 %v1910_v63  ;;  %985 = vmatpush1.bf16.msra.mxu1 %v1913_v0 }
  0x7c   :  { %904 = vmatprep.subr.bf16.mxu0 %v1918_v1  ;;  %986 = vmatprep.subr.bf16.mxu1 %v1921_v2 }
  0x7f   :  { %905 = vmatpush1.bf16.msra.mxu0 %v1916_v3  ;;  %987 = vmatpush1.bf16.msra.mxu1 %v1919_v5  ;;  %v1955_v5 = vld [vmem:[%s2536_s5] sm:$0xff]  }
  0x80   :  { %1640 = vmatprep.subr.bf16.mxu0 %v1923_v6  ;;  %1662 = vmatprep.subr.bf16.mxu1 %v1924_v7 }
  0x82   :  { %907 = vmatmul.mubr.bf16.vlgmr.msra.gmra.mrb[0].mxu0 %v1468_v8  ;;  %989 = vmatmul.mubr.bf16.vlgmr.msra.gmra.mrb[0].mxu1 %v1468_v8  ;;  %v1956_v8 = vld [vmem:[%s2536_s5 + $0x8] sm:$0xff]  }
  0x83   :  { %1641 = vmatpush3.bf16.msra.mxu0 %v1925_v9  ;;  %1663 = vmatpush3.bf16.msra.mxu1 %v1926_v10  ;;  %v1957_v9 = vld [vmem:[%s2536_s5 + $0x10] sm:$0xff]   ;;  %v1958_v10 = vld [vmem:[%s2536_s5 + $0x18] sm:$0xff]  }
  0x84   :  { %1642 = vmatprep.subr.bf16.mxu0 %v1927_v11  ;;  %1664 = vmatprep.subr.bf16.mxu1 %v1928_v4  ;;  %v1959_v11 = vld [vmem:[%s2536_s5 + $0x20] sm:$0xff]   ;;  %v1960_v4 = vld [vmem:[%s2536_s5 + $0x28] sm:$0xff]  }
  0x87   :  { %1643 = vmatpush3.bf16.msra.mxu0 %v1929_v12  ;;  %1665 = vmatpush3.bf16.msra.mxu1 %v1930_v13  ;;  %v1961_v12 = vld [vmem:[%s2536_s5 + $0x30] sm:$0xff]   ;;  %v1962_v13 = vld [vmem:[%s2536_s5 + $0x38] sm:$0xff]  }
  0x88   :  { %1644 = vmatprep.subr.bf16.mxu0 %v1931_v14  ;;  %1666 = vmatprep.subr.bf16.mxu1 %v1932_v15 }
  0x8b   :  { %1645 = vmatpush3.bf16.msra.mxu0 %v1933_v16  ;;  %1667 = vmatpush3.bf16.msra.mxu1 %v1934_v17  ;;  %v1598_v16 = vld [vmem:[%s2538_s4] ss:$0 sm:$0xff] }
  0x8c   :  { %1646 = vmatprep.subr.bf16.mxu0 %v1935_v18  ;;  %1668 = vmatprep.subr.bf16.mxu1 %v1936_v19 }
  0x8f   :  { %1647 = vmatpush3.bf16.msra.mxu0 %v1937_v20  ;;  %1669 = vmatpush3.bf16.msra.mxu1 %v1938_v21 }
  0x90   :  { %1648 = vmatprep.subr.bf16.mxu0 %v1939_v22  ;;  %1670 = vmatprep.subr.bf16.mxu1 %v1940_v23 }
  0x93   :  { %1649 = vmatpush3.bf16.msra.mxu0 %v1941_v24  ;;  %1671 = vmatpush3.bf16.msra.mxu1 %v1942_v25 }
  0x94   :  { %1650 = vmatprep.subr.bf16.mxu0 %v1943_v26  ;;  %1672 = vmatprep.subr.bf16.mxu1 %v1944_v27 }
  0x97   :  { %1651 = vmatpush3.bf16.msra.mxu0 %v1945_v28  ;;  %1673 = vmatpush3.bf16.msra.mxu1 %v1946_v29  ;;  %v1631_v29 = vld [vmem:[%s2539_s6] ss:$0 sm:$0xff] }
  0x98   :  { %1652 = vmatprep.subr.bf16.mxu0 %v1947_v30  ;;  %1674 = vmatprep.subr.bf16.mxu1 %v1948_v31 }
  0x9b   :  { %1653 = vmatpush3.bf16.msra.mxu0 %v1949_v32  ;;  %1675 = vmatpush3.bf16.msra.mxu1 %v1950_v33 }
  0x9c   :  { %1654 = vmatprep.subr.bf16.mxu0 %v1951_v34  ;;  %1676 = vmatprep.subr.bf16.mxu1 %v1952_v35 }
  0x9f   :  { %1655 = vmatpush3.bf16.msra.mxu0 %v1953_v36  ;;  %1677 = vmatpush3.bf16.msra.mxu1 %v1954_v37 }
  0xa0   :  { %1693 = vmatprep.subr.bf16.mxu0 %v1963_v38 }
 0x155   :  { %v908_v50 = vpop.f32.mrb[0].mxu0  ;;  %v990_v51 = vpop.f32.mrb[0].mxu1 }
 0x156   :  { %v1713_v52 = vadd.f32 %v908_v50, %v162_v46  ;;  %v1715_v53 = vadd.f32 %v990_v51, %v170_v47  ;;  %v910_v54 = vpop.f32.mrb[1].mxu0  ;;  %v992_v55 = vpop.f32.mrb[1].mxu1 }
 0x157   :  { %v1714_v56 = vadd.f32 %v910_v54, %v166_v48  ;;  %v1716_v57 = vadd.f32 %v992_v55, %v174_v49  ;;  %v912_v58 = vpop.f32.mrb[2].mxu0  ;;  %v994_v59 = vpop.f32.mrb[2].mxu1 }
 0x158   :  { %v997_v60 = vmax.f32 %v1713_v52, 0.0  ;;  %v999_v61 = vmax.f32 %v1715_v53, 0.0  ;;  %v913_v62 = vpop.f32.mrb[3].mxu0  ;;  %v995_v63 = vpop.f32.mrb[3].mxu1 }
 0x159   :  { %v998_v0 = vmax.f32 %v1714_v56, 0.0  ;;  %v1000_v1 = vmax.f32 %v1716_v57, 0.0 }
 0x15a   :  { %v1001_v6 = vpack.c.bf16 %v997_v60, %v997_v60  ;;  %v1003_v7 = vpack.c.bf16 %v999_v61, %v999_v61 }
 0x15b   :  { %v1002_v2 = vpack.c.bf16 %v998_v0, %v998_v0  ;;  %v1004_v3 = vpack.c.bf16 %v1000_v1, %v1000_v1 }
 0x15d   :  { %1300 = vmatprep.mubr.bf16.mxu0 %v1002_v2  ;;  %1340 = vmatprep.mubr.bf16.mxu1 %v1004_v3 }
 0x15e   :  { %1301 = vmatmul.mubr.bf16.vlgmr.msra.gmra.mrb[4].mxu0 %v1001_v6  ;;  %1341 = vmatmul.mubr.bf16.vlgmr.msra.gmra.mrb[4].mxu1 %v1003_v7 }
 0x15f   :  { %1694 = vmatpush3.bf16.msra.mxu0 %v1955_v5  ;;  %1709 = vmatprep.mubr.msk.bf16.mxu0 %vm1964_vm0, %v1963_v38 }
 0x160   :  { %1695 = vmatprep.subr.bf16.mxu0 %v1963_v38 }
 0x163   :  { %1696 = vmatpush3.bf16.msra.mxu0 %v1956_v8 }
 0x164   :  { %1697 = vmatprep.subr.bf16.mxu0 %v1963_v38 }
 0x167   :  { %1698 = vmatpush3.bf16.msra.mxu0 %v1957_v9 }
 0x168   :  { %1699 = vmatprep.subr.bf16.mxu0 %v1963_v38 }
 0x16b   :  { %1700 = vmatpush3.bf16.msra.mxu0 %v1958_v10 }
 0x16c   :  { %1701 = vmatprep.subr.bf16.mxu0 %v1963_v38 }
 0x16f   :  { %1702 = vmatpush3.bf16.msra.mxu0 %v1959_v11 }
 0x170   :  { %1703 = vmatprep.subr.bf16.mxu0 %v1963_v38 }
 0x173   :  { %1704 = vmatpush3.bf16.msra.mxu0 %v1960_v4 }
 0x174   :  { %1705 = vmatprep.subr.bf16.mxu0 %v1963_v38 }
 0x177   :  { %1706 = vmatpush3.bf16.msra.mxu0 %v1961_v12 }
 0x178   :  { %1707 = vmatprep.subr.bf16.mxu0 %v1963_v38 }
 0x17b   :  { %1708 = vmatpush3.bf16.msra.mxu0 %v1962_v13 }
 0x231   :  { %v1656_v14 = vpop.f32.mrb[4].mxu0  ;;  %v1678_v15 = vpop.f32.mrb[4].mxu1 }
 0x232   :  { %v1657_v17 = vpop.f32.mrb[5].mxu0  ;;  %v1679_v18 = vpop.f32.mrb[5].mxu1 }
 0x233   :  { %v1658_v19 = vadd.f32 %v1657_v17, %v1656_v14  ;;  %v1680_v20 = vadd.f32 %v1679_v18, %v1678_v15  ;;  %v1659_v21 = vpop.f32.mrb[6].mxu0  ;;  %v1681_v22 = vpop.f32.mrb[6].mxu1 }
 0x234   :  { %v1660_v23 = vpop.f32.mrb[7].mxu0  ;;  %v1682_v24 = vpop.f32.mrb[7].mxu1 }
 0x235   :  { %v1303_v25 = vadd.f32 %v1658_v19, %v1598_v16 }
 0x237   :  { %v1343_v26 = vadd.f32 %v1680_v20, %v1303_v25 }
 0x239   :  { %v1348_v27 = vmax.f32 %v1343_v26, 0.0 }
 0x23b   :  { %v1349_v28 = vpack.c.bf16 %v1348_v27, %v1348_v27 }
 0x23d   :  { %1710 = vmatmul.mubr.bf16.vlgmr.msra.gmra.mrb[8].mxu0 %v1349_v28 }
 0x310   :  { %v1455_v30 = vpop.f32.mrb[8].mxu0 }
 0x311   :  { %v1456_v31 = vadd.f32 %v1631_v29, %v1455_v30  ;;  %v1711_v32 = vpop.f32.mrb[9].mxu0 }
 0x312   :  { %v1458_v33 = vpop.f32.mrb[10].mxu0 }
 0x313   :  { %1461 = vst [vmem:[%s2540_s7] sm:$0xff] %v1456_v31  ;;  %v1712_v34 = vpop.f32.mrb[11].mxu0 }

</bundles_post_ra>
